<compile_context>
chip_gen: v7x
topology: tpu7x:2x2x1
jax: 0.10.0
libtpu: 0.0.40
codegen_flags: <defaults>
</compile_context>

<pallas_src>
import jax
import jax.numpy as jnp
from jax.experimental import pallas as pl
from jax.experimental.pallas import tpu as pltpu

IN_FEATURES = 2 * 64       # 128
HIDDEN = 2 * 64            # 128
NCLASSES = 10              # small synthetic class count
LANE = 128                 # TPU lane width; narrow logits dim is padded to this


def classifier_kernel(x_ref, w1_ref, b1_ref, w2_ref, b2_ref, o_ref):
    """Fused MLP forward on one batch tile: relu(x @ W1 + b1) @ W2 + b2.

    x arrives f32 and is cast to bf16 on the VPU (free in this mem-bound
    regime); both dots accumulate in f32 on the MXU; bias / ReLU stay f32;
    the output store is bf16, lane-dense (unmasked vst on the lane axis).
    """
    x = x_ref[...].astype(jnp.bfloat16)                         # in-kernel cast
    h = jnp.dot(x, w1_ref[...], preferred_element_type=jnp.float32)
    h = jnp.maximum(h + b1_ref[...], 0.0)                       # (tb, 128) f32
    out = jnp.dot(h.astype(jnp.bfloat16), w2_ref[...],
                  preferred_element_type=jnp.float32)
    o_ref[...] = (out + b2_ref[...]).astype(o_ref.dtype)        # (tb, 128) bf16


def _round_up(n, m):
    return ((n + m - 1) // m) * m


def _pick_tile(batch):
    """Large batch tiles (amortize ~0.35 us per grid step, hit HBM roofline)
    while keeping an even, >=2 number of grid steps when the batch allows it
    so v7x's two TensorCores get balanced work under ('parallel',)."""
    if batch <= 16:
        return _round_up(batch, 8)
    n_tiles = max(2, pl.cdiv(batch, 1024))
    if n_tiles % 2:
        n_tiles += 1                       # even step count for megacore balance
    return _round_up(pl.cdiv(batch, n_tiles), 8)


def classifier_forward(x, w1, b1, w2, b2, *, tb=None, padded_output=False):
    """x: (B, 128) f32.  w1: (128,128) (out,in).  w2: (nclasses,128) (out,in).

    Returns (B, nclasses) f32 logits == relu(x @ W1.T + b1) @ W2.T + b2.
    With padded_output=True, returns the raw (B, 128) bf16 lane-dense slab
    (columns >= nclasses are garbage from zero-padded weights == exact 0 bias
    contribution) so downstream consumers can skip the slice pass entirely.
    """
    B, D = x.shape
    assert D == IN_FEATURES
    nclasses = w2.shape[0]
    assert nclasses <= LANE

    if tb is None:
        tb = _pick_tile(B)
    num_tiles = pl.cdiv(B, tb)

    # Wrapper glue limited to the tiny weight/bias tensors (one-time, ~100 KiB):
    #  * pre-transpose weights to (in, out), cast to bf16
    #  * zero-pad the 2nd layer's output dim nclasses -> 128 (lane-dense stores)
    # x is NOT padded / pre-cast: Pallas masks the partial trailing batch block
    # (safe: no cross-row reduction in the kernel) and the f32->bf16 cast
    # happens in-kernel.
    w1_t = w1.T.astype(jnp.bfloat16)                               # (128, 128)
    w2_t = jnp.zeros((HIDDEN, LANE), jnp.bfloat16).at[:, :nclasses].set(
        w2.T.astype(jnp.bfloat16))                                 # (128, 128)
    b1_r = b1.reshape(1, HIDDEN).astype(jnp.float32)               # (1, 128)
    b2_r = jnp.zeros((1, LANE), jnp.float32).at[:, :nclasses].set(
        b2.astype(jnp.float32))                                    # (1, 128)

    cost = pl.CostEstimate(
        flops=2 * B * IN_FEATURES * HIDDEN + 2 * B * HIDDEN * LANE,
        transcendentals=0,
        bytes_accessed=(B * IN_FEATURES * 4          # x (f32 in)
                        + B * LANE * 2               # logits (bf16 out)
                        + (IN_FEATURES * HIDDEN + HIDDEN * LANE) * 2  # weights
                        + (HIDDEN + LANE) * 4))      # biases

    # NOTE: weight/bias index_maps are constant, so Pallas does not re-DMA them
    # across grid steps; their double-buffer reservation is <200 KiB (noise).
    out = pl.pallas_call(
        classifier_kernel,
        out_shape=jax.ShapeDtypeStruct((B, LANE), jnp.bfloat16),
        grid_spec=pl.GridSpec(
            grid=(num_tiles,),
            in_specs=[
                pl.BlockSpec((tb, IN_FEATURES), lambda i: (i, 0)),      # x tile
                pl.BlockSpec((IN_FEATURES, HIDDEN), lambda i: (0, 0)),  # W1^T
                pl.BlockSpec((1, HIDDEN), lambda i: (0, 0)),            # b1
                pl.BlockSpec((HIDDEN, LANE), lambda i: (0, 0)),         # W2^T (padded)
                pl.BlockSpec((1, LANE), lambda i: (0, 0)),              # b2  (padded)
            ],
            out_specs=pl.BlockSpec((tb, LANE), lambda i: (i, 0)),
        ),
        compiler_params=pltpu.CompilerParams(
            dimension_semantics=("parallel",)),
        cost_estimate=cost,
    )(x.astype(jnp.float32), w1_t, b1_r, w2_t, b2_r)

    if padded_output:
        return out                                   # (B, 128) bf16, lane-dense
    # PyTorch-parity view: upcast/slice only the real class columns.
    return out[:, :nclasses].astype(jnp.float32)


def init_params(key, nclasses):
    """Deterministic init mimicking nn.Linear's uniform(-1/sqrt(fan_in), +)."""
    k1, k2, k3, k4 = jax.random.split(key, 4)
    bound1 = 1.0 / jnp.sqrt(IN_FEATURES)
    bound2 = 1.0 / jnp.sqrt(HIDDEN)
    w1 = jax.random.uniform(k1, (HIDDEN, IN_FEATURES), jnp.float32,
                            -bound1, bound1)
    b1 = jax.random.uniform(k2, (HIDDEN,), jnp.float32, -bound1, bound1)
    w2 = jax.random.uniform(k3, (nclasses, HIDDEN), jnp.float32,
                            -bound2, bound2)
    b2 = jax.random.uniform(k4, (nclasses,), jnp.float32, -bound2, bound2)
    return w1, b1, w2, b2


if __name__ == "__main__":
    key = jax.random.PRNGKey(0)
    kx, kp = jax.random.split(key)

    # B=30 deliberately not a multiple of the tile (tb=16, 2 grid steps) to
    # exercise Pallas' masked partial trailing block (no wrapper pad anymore).
    B = 30
    x = jax.random.normal(kx, (B, IN_FEATURES), jnp.float32)
    w1, b1, w2, b2 = init_params(kp, NCLASSES)

    out = classifier_forward(x, w1, b1, w2, b2)
    out = jax.block_until_ready(out)

    # Pure-JAX f32 reference (same math as the PyTorch module). Tolerance is
    # loosened because x/W stream as bf16 and logits are emitted as bf16.
    ref = jnp.maximum(x @ w1.T + b1, 0.0) @ w2.T + b2
    assert out.shape == (B, NCLASSES)
    assert jnp.allclose(out, ref, atol=5e-2, rtol=5e-2), "mismatch vs reference"

    print("KERNEL_OK")
</pallas_src>

<mosaic_0001>
module attributes {stable_mosaic.version = 11 : i64} {
  func.func @classifier_kernel(%arg0: i32, %arg1: memref<16x128xf32, #tpu.memory_space<vmem>>, %arg2: memref<128x128xbf16, #tpu.memory_space<vmem>>, %arg3: memref<1x128xf32, #tpu.memory_space<vmem>>, %arg4: memref<128x128xbf16, #tpu.memory_space<vmem>>, %arg5: memref<1x128xf32, #tpu.memory_space<vmem>>, %arg6: memref<16x128xbf16, #tpu.memory_space<vmem>>) attributes {dimension_semantics = [#tpu.dimension_semantics<parallel>], iteration_bounds = array<i64: 2>, scalar_prefetch = 0 : i64, scratch_operands = 0 : i64, tpu.core_type = #tpu.core_type<tc>, window_params = [{transform_indices = @transform_0, window_bounds = array<i64: 16, 128>}, {pipeline_mode = #tpu.pipeline_mode<synchronous>, transform_indices = @transform_1, window_bounds = array<i64: 128, 128>}, {pipeline_mode = #tpu.pipeline_mode<synchronous>, transform_indices = @transform_2, window_bounds = array<i64: 1, 128>}, {pipeline_mode = #tpu.pipeline_mode<synchronous>, transform_indices = @transform_3, window_bounds = array<i64: 128, 128>}, {pipeline_mode = #tpu.pipeline_mode<synchronous>, transform_indices = @transform_4, window_bounds = array<i64: 1, 128>}, {transform_indices = @transform_5, window_bounds = array<i64: 16, 128>}]} {
    %c0 = arith.constant 0 : index
    %c0_0 = arith.constant 0 : index
    %0 = vector.load %arg1[%c0, %c0_0] : memref<16x128xf32, #tpu.memory_space<vmem>>, vector<16x128xf32>
    %1 = arith.truncf %0 : vector<16x128xf32> to vector<16x128xbf16>
    %c0_1 = arith.constant 0 : index
    %c0_2 = arith.constant 0 : index
    %2 = vector.load %arg2[%c0_1, %c0_2] : memref<128x128xbf16, #tpu.memory_space<vmem>>, vector<128x128xbf16>
    %cst = arith.constant dense<0.000000e+00> : vector<16x128xf32>
    %3 = tpu.matmul %1, %2, %cst {dimension_numbers = #tpu.dot_dimension_numbers<[1], [0], [0], [1], [0, 0, 1, 1], [], []>} : vector<16x128xbf16>, vector<128x128xbf16>, vector<16x128xf32> -> vector<16x128xf32>
    %c0_3 = arith.constant 0 : index
    %c0_4 = arith.constant 0 : index
    %4 = vector.load %arg3[%c0_3, %c0_4] : memref<1x128xf32, #tpu.memory_space<vmem>>, vector<1x128xf32>
    %5 = vector.broadcast %4 : vector<1x128xf32> to vector<16x128xf32>
    %6 = arith.addf %3, %5 : vector<16x128xf32>
    %cst_5 = arith.constant 0.000000e+00 : f32
    %7 = vector.broadcast %cst_5 : f32 to vector<16x128xf32>
    %8 = arith.maximumf %6, %7 : vector<16x128xf32>
    %9 = arith.truncf %8 : vector<16x128xf32> to vector<16x128xbf16>
    %c0_6 = arith.constant 0 : index
    %c0_7 = arith.constant 0 : index
    %10 = vector.load %arg4[%c0_6, %c0_7] : memref<128x128xbf16, #tpu.memory_space<vmem>>, vector<128x128xbf16>
    %cst_8 = arith.constant dense<0.000000e+00> : vector<16x128xf32>
    %11 = tpu.matmul %9, %10, %cst_8 {dimension_numbers = #tpu.dot_dimension_numbers<[1], [0], [0], [1], [0, 0, 1, 1], [], []>} : vector<16x128xbf16>, vector<128x128xbf16>, vector<16x128xf32> -> vector<16x128xf32>
    %c0_9 = arith.constant 0 : index
    %c0_10 = arith.constant 0 : index
    %12 = vector.load %arg5[%c0_9, %c0_10] : memref<1x128xf32, #tpu.memory_space<vmem>>, vector<1x128xf32>
    %13 = vector.broadcast %12 : vector<1x128xf32> to vector<16x128xf32>
    %14 = arith.addf %11, %13 : vector<16x128xf32>
    %15 = arith.truncf %14 : vector<16x128xf32> to vector<16x128xbf16>
    %c0_11 = arith.constant 0 : index
    %c0_12 = arith.constant 0 : index
    %16 = vector.load %arg6[%c0_11, %c0_12] : memref<16x128xbf16, #tpu.memory_space<vmem>>, vector<16x128xbf16>
    tpu.vector_store %arg6[%c0_11, %c0_12], %15 {strides = array<i32>} : memref<16x128xbf16, #tpu.memory_space<vmem>>, vector<16x128xbf16>,
    return
  }
  func.func @transform_0(%arg0: i32) -> (i32, i32) {
    %c0_i32 = arith.constant 0 : i32
    %c0_i32_0 = arith.constant 0 : i32
    return %arg0, %c0_i32 : i32, i32
  }
  func.func @transform_1(%arg0: i32) -> (i32, i32) {
    %c0_i32 = arith.constant 0 : i32
    %c0_i32_0 = arith.constant 0 : i32
    %c0_i32_1 = arith.constant 0 : i32
    return %c0_i32, %c0_i32_0 : i32, i32
  }
  func.func @transform_2(%arg0: i32) -> (i32, i32) {
    %c0_i32 = arith.constant 0 : i32
    %c0_i32_0 = arith.constant 0 : i32
    %c0_i32_1 = arith.constant 0 : i32
    return %c0_i32, %c0_i32_0 : i32, i32
  }
  func.func @transform_3(%arg0: i32) -> (i32, i32) {
    %c0_i32 = arith.constant 0 : i32
    %c0_i32_0 = arith.constant 0 : i32
    %c0_i32_1 = arith.constant 0 : i32
    return %c0_i32, %c0_i32_0 : i32, i32
  }
  func.func @transform_4(%arg0: i32) -> (i32, i32) {
    %c0_i32 = arith.constant 0 : i32
    %c0_i32_0 = arith.constant 0 : i32
    %c0_i32_1 = arith.constant 0 : i32
    return %c0_i32, %c0_i32_0 : i32, i32
  }
  func.func @transform_5(%arg0: i32) -> (i32, i32) {
    %c0_i32 = arith.constant 0 : i32
    %c0_i32_0 = arith.constant 0 : i32
    return %arg0, %c0_i32 : i32, i32
  }
}

</mosaic_0001>

<bundles_post_ra>
// kernel: tpu_custom_call.1
= control target key start
LH: loop header
LB: loop body
LE: loop exit
PB: predicated region body
PF: predicated region fallthrough
CT: control target
= control target key end

     0   :  { %10 = vsyncpa [#allocation3], 0  ;;  %s1262_s0 = inlined_call_operand.hbm [shape: f32[30,128], index: 0, kind: input, shape index: {}]   ;;  %s1263_s1 = inlined_call_operand.hbm [shape: bf16[128,128], index: 1, kind: input, shape index: {}]   ;;  %s1264_s2 = inlined_call_operand.vmem [shape: f32[1,128], index: 2, kind: input, shape index: {}]   ;;  %s1265_s3 = inlined_call_operand.hbm [shape: bf16[128,128], index: 3, kind: input, shape index: {}]   ;;  %s1266_s4 = inlined_call_operand.vmem [shape: f32[1,128], index: 4, kind: input, shape index: {}]   ;;  %s1267_s5 = inlined_call_operand.hbm [shape: bf16[30,128], index: 5, kind: output, shape index: {}]  }
   0x1   :  { %12 = vsyncpa [#allocation3 + $0x1], 0 }
   0x2   :  { %13 = vsyncpa [#allocation6], 0 }
   0x3   :  { %14 = vsyncpa [#allocation4], 0 }
   0x4   :  { %16 = vsyncpa [#allocation4 + $0x1], 0  ;;  %s1017_s18 = smov 0   ;;  %s1019_s19 = smov 0  }
   0x5   :  { %s1021_s20 = smov 0   ;;  %s1023_s21 = smov 0  }
   0x6 LB: > { %s1038_s22 = sadd.s32 4294967295, %s973_s21   ;;  %s621_s23 = sadd.s32 4294967294, %s973_s21   ;;  %s973_s21 = sphi %s1023_s21, %s1287_s21   ;;  %s969_s20 = sphi %s1021_s20, %s1286_s20   ;;  %s965_s19 = sphi %s1019_s19, %s1285_s19   ;;  %s961_s18 = sphi %s1017_s18, %s1284_s18  }
   0x7   : > { %p42_p0 = scmp.ne.s32.totalorder %s965_s19, %s961_s18  ;;  %p1268_p1 = scmp.eq.s32.totalorder %s1038_s22, 0 }
   0x8   : > { %p156_p3 = scmp.eq.s32.totalorder %s621_s23, 1  ;;  %p622_p5 = scmp.ge.s32.totalorder %s973_s21, 1 }
   0x9   : > { %p1047_p4 = por %p1268_p1, %p42_p0  ;;  %p163_p7 = scmp.lt.s32.totalorder %s973_s21, 3 }
   0xa   : > { %p1052_p6 = por %p156_p3, %p42_p0  ;;  %s975_s27 = smov [#allocation5]  }
   0xb   : > { %s1271_s24 = scalar_select %p1047_p4, 1, 0 }
   0xc   : > { %s1272_s25 = scalar_select %p1052_p6, 1, 0 }
   0xd   : > { %p1057_p8 = pnand %p622_p5, %p163_p7  ;;  %s175_s28 = sshll.u32 %s975_s27, 4  ;;  %s1061_s28 = int_to_ptr.vmem [resolvable:$true] %s175_s28 }
   0xe   : > { %s976_s30 = smov [#allocation7]   ;;  %s817_s9 = scalar_lea.hbm %s1263_s1, 1024 }
   0xf   : > { %p738_p9 = pneg %p1057_p8  ;;  %s191_s6 = sshll.u32 %s976_s30, 4  ;;  %s1072_s6 = int_to_ptr.vmem [resolvable:$true] %s191_s6 }
  0x10   : > { %p818_p12 = scmp.ne.s32.totalorder %s1263_s1, %s817_s9  ;;  %p824_p5 = scmp.lt.u32.totalorder %s817_s9, %s1263_s1 }
  0x11   : > { %p1068_p11 = pnand %p738_p9, %p1268_p1 }
  0x13   : > { %p819_p13 = pneg %p1068_p11 }
  0x15   : > { %p820_p0 = pnand %p819_p13, %p818_p12 }
  0x17   : > { %p821_p3 = pneg %p820_p0 }
  0x19   : > { %p826_p7 = pnand %p824_p5, %p821_p3 }
  0x1b   : > { %829 = shalt.err (!%p826_p7)
}
  0x1c   : > { %s830_s14 = scalar_lea.vmem %s1061_s28, 1024  ;;  %p838_p2 = scmp.lt.s32.totalorder %s1061_s28, %s1061_s28 }
  0x1d   : > { %p831_p9 = scmp.ne.s32.totalorder %s1061_s28, %s830_s14  ;;  %p839_p12 = scmp.lt.s32.totalorder %s830_s14, %s830_s14 }
  0x1f   : > { %p833_p10 = pnand %p831_p9, %p819_p13  ;;  %p840_p0 = por %p839_p12, %p838_p2 }
  0x21   : > { %p834_p1 = pneg %p833_p10 }
  0x23   : > { %p841_p6 = pnand %p840_p0, %p834_p1 }
  0x25   : > { %844 = shalt.err (!%p841_p6)
}
  0x26   : > { %s977_s15 = smov 64   ;;  %s978_s16 = smov 4  }
  0x27   : > { %741 = dma.hbm_to_vmem [thread:$0]  (!%p1068_p11), %s1263_s1, 1024, %s1061_s28, [#allocation6], %s977_s15, %s977_s15, %s978_s16  }
  0x28   : > { %s845_s7 = scalar_lea.hbm %s1265_s3, 1024 }
  0x29   : > { %p846_p2 = scmp.ne.s32.totalorder %s1265_s3, %s845_s7  ;;  %p852_p10 = scmp.lt.u32.totalorder %s845_s7, %s1265_s3 }
  0x2b   : > { %p848_p1 = pnand %p846_p2, %p819_p13 }
  0x2d   : > { %p849_p6 = pneg %p848_p1 }
  0x2f   : > { %p854_p3 = pnand %p852_p10, %p849_p6 }
  0x31   : > { %857 = shalt.err (!%p854_p3)
}
  0x32   : > { %s858_s28 = scalar_lea.vmem %s1072_s6, 1024  ;;  %p866_p12 = scmp.lt.s32.totalorder %s1072_s6, %s1072_s6 }
  0x33   : > { %p859_p5 = scmp.ne.s32.totalorder %s1072_s6, %s858_s28  ;;  %p867_p0 = scmp.lt.s32.totalorder %s858_s28, %s858_s28 }
  0x35   : > { %p861_p7 = pnand %p859_p5, %p819_p13  ;;  %p868_p2 = por %p867_p0, %p866_p12 }
  0x37   : > { %p862_p9 = pneg %p861_p7 }
  0x39   : > { %p869_p1 = pnand %p868_p2, %p862_p9 }
  0x3b   : > { %872 = shalt.err (!%p869_p1)
}
  0x3c   : > { %744 = dma.hbm_to_vmem [thread:$0]  (!%p1068_p11), %s1265_s3, 1024, %s1072_s6, [#allocation6], %s977_s15, %s977_s15, %s978_s16  }
  0x3d   : > { %s1127_s14 = sadd.s32 1, %s973_s21   ;;  %s29_s29 = sadd.s32 1, %s969_s20 }
  0x3e   : > { %s26_s17 = ssub.s32 %s973_s21, %s1127_s14  ;;  %p36_p13 = scmp.ne.s32.totalorder %s969_s20, %s965_s19 }
  0x3f   : > { %p27_p6 = scmp.eq.s32.totalorder %s26_s17, 0  ;;  %p37_p10 = scmp.eq.s32.totalorder %s973_s21, 0 }
  0x40   : > { %p1275_p3 = scmp.eq.s32.totalorder %s1038_s22, 1  ;;  %p755_p7 = scmp.lt.s32.totalorder %s973_s21, 2 }
  0x41   : > { %s1143_s27 = scalar_select %p27_p6, %s969_s20, %s29_s29  }
  0x42   : > { %p1137_p5 = por %p1275_p3, %p36_p13  ;;  %p38_p9 = por %p37_p10, %p36_p13 }
  0x43   : > { %s208_s30 = sand.u32 1, %s969_s20   ;;  %s659_s6 = sshll.u32 %s973_s21, 8 }
  0x44   : > { %s1276_s23 = scalar_select %p1137_p5, 1, 0 }
  0x45   : > { %s626_s7 = sshll.u32 %s208_s30, 4  ;;  %s1150_s8 = scalar_lea.hbm %s1262_s0, %s659_s6 }
  0x46   : > { %s212_s9 = scalar_lea.vmem [#allocation2], %s626_s7  ;;  %p1154_p11 = pnand %p755_p7, %p38_p9 }
  0x47   : > { %s219_s10 = sshll.u32 %s212_s9, 4  ;;  %s1158_s28 = scalar_lea.sflag [#allocation3], %s208_s30  ;;  %s1152_s10 = int_to_ptr.vmem [resolvable:$true] %s219_s10 }
  0x48   : > { %s873_s12 = scalar_lea.hbm %s1150_s8, 256  ;;  %p875_p0 = pneg %p1154_p11 }
  0x49   : > { %p874_p12 = scmp.ne.s32.totalorder %s1150_s8, %s873_s12  ;;  %s878_s17 = scalar_lea.hbm %s1262_s0, 512 }
  0x4a   : > { %p879_p13 = scmp.lt.u32.totalorder %s1150_s8, %s1262_s0  ;;  %p880_p6 = scmp.lt.u32.totalorder %s878_s17, %s873_s12 }
  0x4b   : > { %p876_p2 = pnand %p875_p0, %p874_p12  ;;  %p882_p3 = scmp.lt.u32.totalorder %s873_s12, %s1150_s8 }
  0x4c   : > { %p881_p10 = por %p880_p6, %p879_p13 }
  0x4d   : > { %p877_p1 = pneg %p876_p2 }
  0x4e   : > { %p883_p7 = por %p882_p3, %p881_p10 }
  0x50   : > { %p884_p9 = pnand %p883_p7, %p877_p1 }
  0x52   : > { %887 = shalt.err (!%p884_p9)
}
  0x53   : > { %s888_s30 = scalar_lea.vmem %s1152_s10, 256  ;;  %s979_s15 = smov [#allocation2]  }
  0x54   : > { %p889_p12 = scmp.ne.s32.totalorder %s1152_s10, %s888_s30  ;;  %s893_s16 = sshll.u32 %s979_s15, 4  ;;  %s894_s16 = int_to_ptr.vmem [resolvable:$false] %s893_s16 }
  0x55   : > { %s895_s9 = scalar_lea.vmem %s894_s16, 512  ;;  %p896_p4 = scmp.lt.s32.totalorder %s1152_s10, %s894_s16 }
  0x56   : > { %p891_p2 = pnand %p889_p12, %p875_p0  ;;  %p897_p13 = scmp.lt.s32.totalorder %s895_s9, %s888_s30 }
  0x58   : > { %p892_p5 = pneg %p891_p2  ;;  %p898_p6 = por %p897_p13, %p896_p4 }
  0x5a   : > { %p899_p10 = pnand %p898_p6, %p892_p5 }
  0x5c   : > { %902 = shalt.err (!%p899_p10)
}
  0x5d   : > { %s980_s12 = smov 128   ;;  %s981_s13 = smov 8  }
  0x5e   : > { %748 = dma.hbm_to_vmem [thread:$0]  (!%p1154_p11), %s1150_s8, 256, %s1152_s10, %s1158_s28, %s980_s12, %s980_s12, %s981_s13  }
  0x5f   : > { %231 = sbr.rel (%p1057_p8) target bundleno = 593 (0x251), region = 40  ;;  %s1189_s29 = sand.u32 (!%p1057_p8), 1, %s965_s19  }
  0x60   : > { %s630_s17 = sshll.u32 (!%p1057_p8), %s1189_s29, 4  ;;  %s234_s7 = scalar_lea.sflag (!%p1057_p8), [#allocation3], %s1189_s29 }
  0x61   : > { %s1193_s6 = scalar_lea.vmem (!%p1057_p8), [#allocation2], %s630_s17  ;;  %p1278_p4 = scmp.ne.s32.totalorder (!%p1057_p8), %s1271_s24, 0 }
  0x66   : > { %948 = dma.done.wait (%p1278_p4), %s234_s7, 256  }
  0x67   : > { %950 = vsyncadd (%p1278_p4), %s234_s7, 4294967040  ;;  %p1279_p5 = scmp.eq.s32.totalorder %s1038_s22, 0 }
  0x69   : > { %952 = dma.done.wait (%p1279_p5), [#allocation6], 2048   ;;  %p1280_p8 = pmov %p1279_p5 }
  0x6a   : > { %v982_v0 = vmov 0.0   ;;  %vm983_vm0 = vmmov 0   ;;  %v801_v1 = vld [vmem:[#allocation5] sm:$0xff]   ;;  %v802_v2 = vld [vmem:[#allocation5 + $0x8] sm:$0xff]   ;;  %v803_v3 = vld [vmem:[#allocation5 + $0x10] sm:$0xff]   ;;  %s633_s8 = sshll.u32 %s1189_s29, 3 }
  0x6b   : > { %954 = vsyncadd (%p1280_p8), [#allocation6], 4294965248  ;;  %686 = vmatprep.subr.bf16.mxu0 %v982_v0  ;;  %702 = vmatprep.mubr.msk.bf16.mxu0 %vm983_vm0, %v982_v0  ;;  %v809_v4 = vld [vmem:[#allocation7] sm:$0xff]   ;;  %v804_v5 = vld [vmem:[#allocation5 + $0x18] sm:$0xff]   ;;  %s271_s28 = scalar_lea.vmem [#allocation8], %s633_s8  ;;  %s662_s15 = sshll.u32 %s1038_s22, 7 }
  0x6c   : > { %706 = vmatprep.subr.bf16.mxu1 %v982_v0  ;;  %722 = vmatprep.mubr.msk.bf16.mxu1 %vm983_vm0, %v982_v0  ;;  %v810_v6 = vld [vmem:[#allocation7 + $0x8] sm:$0xff]   ;;  %v805_v7 = vld [vmem:[#allocation5 + $0x20] sm:$0xff]   ;;  %v811_v8 = vld [vmem:[#allocation7 + $0x10] sm:$0xff]   ;;  %s529_s30 = sshll.u32 %s271_s28, 4  ;;  %s1218_s12 = scalar_lea.hbm %s1267_s5, %s662_s15  ;;  %s1213_s30 = int_to_ptr.vmem [resolvable:$true] %s529_s30 }
  0x6d   : > { %687 = vmatpush3.bf16.msra.mxu0 %v801_v1  ;;  %707 = vmatpush3.bf16.msra.mxu1 %v809_v4  ;;  %v806_v9 = vld [vmem:[#allocation5 + $0x28] sm:$0xff]   ;;  %v812_v10 = vld [vmem:[#allocation7 + $0x18] sm:$0xff]   ;;  %v807_v11 = vld [vmem:[#allocation5 + $0x30] sm:$0xff]   ;;  %s516_s13 = scalar_lea.sflag [#allocation4], %s1189_s29  ;;  %s903_s17 = scalar_lea.vmem %s1213_s30, 128 }
  0x6e   : > { %688 = vmatprep.subr.bf16.mxu0 %v982_v0  ;;  %708 = vmatprep.subr.bf16.mxu1 %v982_v0  ;;  %v813_v12 = vld [vmem:[#allocation7 + $0x20] sm:$0xff]   ;;  %v808_v13 = vld [vmem:[#allocation5 + $0x38] sm:$0xff]   ;;  %v814_v16 = vld [vmem:[#allocation7 + $0x28] sm:$0xff]   ;;  %p904_p11 = scmp.ne.s32.totalorder %s1213_s30, %s903_s17  ;;  %p1281_p0 = scmp.ne.s32.totalorder %s1276_s23, 0 }
  0x6f   : > { %v275_v14 = vld [vmem:[%s1193_s6] sm:$0xff]  ;;  %v276_v15 = vld [vmem:[%s1193_s6 + $0x8] sm:$0xff]  ;;  %s984_s22 = smov [#allocation8]  }
  0x70   : > { %v277_v17 = vpack.c.bf16 %v276_v15, %v275_v14  ;;  %v815_v18 = vld [vmem:[#allocation7 + $0x30] sm:$0xff]   ;;  %v816_v19 = vld [vmem:[#allocation7 + $0x38] sm:$0xff]   ;;  %v634_v20 = vld [vmem:[%s1264_s2] ss:$0 sm:$0xff]  ;;  %p905_p1 = pnand %p904_p11, %p1281_p0  ;;  %s907_s7 = sshll.u32 %s984_s22, 4  ;;  %s908_s7 = int_to_ptr.vmem [resolvable:$false] %s907_s7 }
  0x71   : > { %689 = vmatpush3.bf16.msra.mxu0 %v802_v2  ;;  %709 = vmatpush3.bf16.msra.mxu1 %v810_v6  ;;  %v643_v30 = vld [vmem:[%s1266_s4] ss:$0 sm:$0xff]  ;;  %s909_s6 = scalar_lea.vmem %s908_s7, 256  ;;  %p910_p7 = scmp.lt.s32.totalorder %s1213_s30, %s908_s7 }
  0x72   : > { %690 = vmatprep.subr.bf16.mxu0 %v982_v0  ;;  %710 = vmatprep.subr.bf16.mxu1 %v982_v0  ;;  %p906_p3 = pneg %p905_p1  ;;  %p911_p9 = scmp.lt.s32.totalorder %s909_s6, %s903_s17 }
  0x74   : > { %p912_p12 = por %p911_p9, %p910_p7 }
  0x75   : > { %691 = vmatpush3.bf16.msra.mxu0 %v803_v3  ;;  %711 = vmatpush3.bf16.msra.mxu1 %v811_v8 }
  0x76   : > { %692 = vmatprep.subr.bf16.mxu0 %v982_v0  ;;  %712 = vmatprep.subr.bf16.mxu1 %v982_v0  ;;  %p913_p2 = pnand %p912_p12, %p906_p3 }
  0x79   : > { %693 = vmatpush3.bf16.msra.mxu0 %v804_v5  ;;  %713 = vmatpush3.bf16.msra.mxu1 %v812_v10 }
  0x7a   : > { %694 = vmatprep.subr.bf16.mxu0 %v982_v0  ;;  %714 = vmatprep.subr.bf16.mxu1 %v982_v0 }
  0x7d   : > { %695 = vmatpush3.bf16.msra.mxu0 %v805_v7  ;;  %715 = vmatpush3.bf16.msra.mxu1 %v813_v12 }
  0x7e   : > { %696 = vmatprep.subr.bf16.mxu0 %v982_v0  ;;  %716 = vmatprep.subr.bf16.mxu1 %v982_v0 }
  0x81   : > { %697 = vmatpush3.bf16.msra.mxu0 %v806_v9  ;;  %717 = vmatpush3.bf16.msra.mxu1 %v814_v16 }
  0x82   : > { %698 = vmatprep.subr.bf16.mxu0 %v982_v0  ;;  %718 = vmatprep.subr.bf16.mxu1 %v982_v0 }
  0x85   : > { %699 = vmatpush3.bf16.msra.mxu0 %v807_v11  ;;  %719 = vmatpush3.bf16.msra.mxu1 %v815_v18 }
  0x86   : > { %700 = vmatprep.subr.bf16.mxu0 %v982_v0  ;;  %720 = vmatprep.subr.bf16.mxu1 %v982_v0 }
  0x89   : > { %701 = vmatpush3.bf16.msra.mxu0 %v808_v13  ;;  %721 = vmatpush3.bf16.msra.mxu1 %v816_v19 }
  0x8c   : > { %703 = vmatmul.mubr.bf16.vlgmr.msra.gmra.mrb[0].mxu0 %v277_v17 }
 0x15f   : > { %v383_v21 = vpop.f32.mrb[0].mxu0 }
 0x160   : > { %v384_v22 = vadd.f32 %v634_v20, %v383_v21  ;;  %v704_v23 = vpop.f32.mrb[1].mxu0 }
 0x161   : > { %v386_v24 = vpop.f32.mrb[2].mxu0 }
 0x162   : > { %v387_v25 = vadd.f32 %v634_v20, %v386_v24  ;;  %v705_v26 = vpop.f32.mrb[3].mxu0  ;;  %v390_v27 = vmax.f32 %v384_v22, 0.0 }
 0x164   : > { %v391_v28 = vmax.f32 %v387_v25, 0.0 }
 0x166   : > { %v392_v29 = vpack.c.bf16 %v391_v28, %v390_v27 }
 0x168   : > { %723 = vmatmul.mubr.bf16.vlgmr.msra.gmra.mrb[0].mxu1 %v392_v29 }
 0x23b   : > { %v498_v31 = vpop.f32.mrb[0].mxu1 }
 0x23c   : > { %v724_v32 = vpop.f32.mrb[1].mxu1  ;;  %v499_v34 = vadd.f32 %v643_v30, %v498_v31 }
 0x23d   : > { %v501_v33 = vpop.f32.mrb[2].mxu1 }
 0x23e   : > { %v502_v35 = vadd.f32 %v643_v30, %v501_v33  ;;  %v725_v36 = vpop.f32.mrb[3].mxu1 }
 0x240   : > { %v666_v37 = vpack.c.bf16 %v502_v35, %v499_v34 }
 0x242   : > { %667 = vst [vmem:[%s271_s28] sm:$0xff] %v666_v37  }
 0x243   : > { %916 = shalt.err (!%p913_p2)
}
 0x244   : > { %s917_s24 = scalar_lea.hbm %s1218_s12, 128  ;;  %s921_s10 = scalar_lea.hbm %s1267_s5, 256 }
 0x245   : > { %p918_p13 = scmp.ne.s32.totalorder %s1218_s12, %s917_s24  ;;  %p922_p4 = scmp.lt.u32.totalorder %s1218_s12, %s1267_s5 }
 0x246   : > { %p923_p5 = scmp.lt.u32.totalorder %s921_s10, %s917_s24  ;;  %p925_p11 = scmp.lt.u32.totalorder %s917_s24, %s1218_s12 }
 0x247   : > { %p919_p6 = pnand %p918_p13, %p1281_p0 }
 0x248   : > { %p924_p8 = por %p923_p5, %p922_p4 }
 0x249   : > { %p920_p10 = pneg %p919_p6 }
 0x24a   : > { %p926_p1 = por %p925_p11, %p924_p8 }
 0x24c   : > { %p927_p3 = pnand %p926_p1, %p920_p10 }
 0x24e   : > { %930 = shalt.err (!%p927_p3)
}
 0x24f   : > { %s985_s15 = smov 64   ;;  %s986_s16 = smov 4  }
 0x250   : > { %736 = dma.vmem_to_hbm [thread:$0]  (%p1281_p0), %s1213_s30, 128, %s1218_s12, %s516_s13, %s985_s15, %s985_s15, %s986_s16  }
 0x251 PF: > { %s544_s9 = sand.u32 1, %s961_s18   ;;  %p1282_p7 = scmp.ne.s32.totalorder %s1272_s25, 0 }
 0x252   : > { %p1283_p9 = scmp.ge.s32.totalorder %s973_s21, 2  ;;  %s545_s17 = scalar_lea.sflag [#allocation4], %s544_s9 }
 0x254   : > { %p750_p12 = pnand %p1283_p9, %p1282_p7 }
 0x256   : > { %956 = dma.done.wait (!%p750_p12), %s545_s17, 128  }
 0x257   : > { %958 = vsyncadd (!%p750_p12), %s545_s17, 4294967168  ;;  %p19_p2 = scmp.ge.s32.totalorder %s1127_s14, 4   ;;  %s1284_s18 = smov %s965_s19 }
 0x258   : > { %s1285_s19 = smov %s969_s20  ;;  %s1286_s20 = smov %s1143_s27 }
 0x259   : > { %s1287_s21 = smov %s1127_s14  ;;  %21 = sbr.rel (!%p19_p2) target bundleno = 6 (0x6), region = 93 }
 0x260   :  { %550 = vsyncpa [#allocation3], 1 }
 0x261   :  { %552 = vsyncpa [#allocation3 + $0x1], 1 }
 0x262   :  { %553 = vsyncpa [#allocation6], 1 }
 0x263   :  { %554 = vsyncpa [#allocation4], 1 }
 0x264   :  { %556 = vsyncpa [#allocation4 + $0x1], 1 }

</bundles_post_ra>
